<compile_context>
chip_gen: v5e
topology: v5e:2x2
jax: 0.10.0
libtpu: 0.0.40
codegen_flags: <defaults>
</compile_context>

<pallas_src>
import functools

import jax
import jax.numpy as jnp
from jax.experimental import pallas as pl
from jax.experimental.pallas import tpu as pltpu


# ----------------------------------------------------------------------------
# Tile-size selection (biggest tile that keeps the double-buffered logits block
# comfortably inside the default scoped-VMEM budget on v5e/v6e/v7x).
# ----------------------------------------------------------------------------
def _choose_t_tile(n_cls, t_total, *, max_tile=2048, vmem_budget_bytes=8 << 20):
    per_frame = 2 * n_cls * 4  # double-buffered f32 logits bytes per frame
    if t_total <= max_tile and t_total * per_frame <= vmem_budget_bytes:
        return t_total                      # one full-T block per batch row
    tile = 128                              # multiples of 128 -> lane-dense blocks
    while tile * 2 <= max_tile and (tile * 2) * per_frame <= vmem_budget_bytes:
        tile *= 2
    return min(tile, t_total)


def _choose_n_tile(n_rows, n_cls, *, max_tile=1024, vmem_budget_bytes=8 << 20):
    per_row = 2 * n_cls * 4
    if n_rows <= max_tile and n_rows * per_row <= vmem_budget_bytes:
        return n_rows
    tile = 8                                # multiples of 8 (sublane axis)
    while tile * 2 <= max_tile and (tile * 2) * per_row <= vmem_budget_bytes:
        tile *= 2
    return min(tile, n_rows)


# ----------------------------------------------------------------------------
# 3-D path: logits (B, C, T), labels (B, T). Classes on sublanes, frames on lanes.
# ----------------------------------------------------------------------------
def _cd_accuracy_bct_kernel(logits_ref, lab_ref, match_ref, *, t_total, t_tile):
    j = pl.program_id(1)

    logits = logits_ref[...]                                         # (C, t_tile) f32
    labels = lab_ref[...]                                            # (1, t_tile) i32

    n_cls = logits.shape[0]
    # argmax over the class (sublane) axis, first-max-wins (matches torch.max)
    max_val = jnp.max(logits, axis=0, keepdims=True)                 # (1, t_tile)
    cls_idx = jax.lax.broadcasted_iota(jnp.int32, logits.shape, 0)   # (C, t_tile)
    pred = jnp.min(jnp.where(logits == max_val, cls_idx, jnp.int32(n_cls)),
                   axis=0, keepdims=True)                            # (1, t_tile)

    # mask frames of the (possibly partial) tail block
    frame_idx = j * t_tile + jax.lax.broadcasted_iota(jnp.int32, (1, t_tile), 1)
    match = jnp.logical_and(pred == labels, frame_idx < t_total)

    match_ref[...] = match.astype(jnp.int32)                         # lane-dense store


def _cd_accuracy_bct(logits, labels):
    B, C, T = logits.shape
    t_tile = _choose_t_tile(C, T)
    n_t = pl.cdiv(T, t_tile)

    labels3 = jnp.asarray(labels).reshape(B, 1, T).astype(jnp.int32)  # free view, no copy
    kernel = functools.partial(_cd_accuracy_bct_kernel, t_total=T, t_tile=t_tile)

    matches = pl.pallas_call(
        kernel,
        out_shape=jax.ShapeDtypeStruct((B * n_t, 1, t_tile), jnp.int32),
        grid_spec=pltpu.PrefetchScalarGridSpec(
            num_scalar_prefetch=0,
            grid=(B, n_t),
            in_specs=[
                pl.BlockSpec((pl.Squeezed(), C, t_tile), lambda i, j: (i, 0, j)),
                pl.BlockSpec((pl.Squeezed(), 1, t_tile), lambda i, j: (i, 0, j)),
            ],
            out_specs=pl.BlockSpec((pl.Squeezed(), 1, t_tile),
                                   lambda i, j: (i * n_t + j, 0, 0)),
        ),
        compiler_params=pltpu.CompilerParams(
            dimension_semantics=("parallel", "parallel")),
    )(logits, labels3)

    total = jnp.sum(matches)                     # exact int32 correct-frame count
    return total.astype(jnp.float32) / jnp.float32(B * T)


# ----------------------------------------------------------------------------
# 2-D path: logits (N, C), labels (N,). Classes already on the lane axis.
# ----------------------------------------------------------------------------
def _cd_accuracy_nc_kernel(logits_ref, lab_ref, match_ref, *, n_total, n_tile):
    i = pl.program_id(0)

    logits = logits_ref[...]                                         # (n_tile, C) f32
    labels = lab_ref[...]                                            # (n_tile, 1) i32

    n_cls = logits.shape[1]
    max_val = jnp.max(logits, axis=1, keepdims=True)                 # (n_tile, 1)
    cls_idx = jax.lax.broadcasted_iota(jnp.int32, logits.shape, 1)   # (n_tile, C)
    pred = jnp.min(jnp.where(logits == max_val, cls_idx, jnp.int32(n_cls)),
                   axis=1, keepdims=True)                            # (n_tile, 1)

    row_idx = i * n_tile + jax.lax.broadcasted_iota(jnp.int32, (n_tile, 1), 0)
    match = jnp.logical_and(pred == labels, row_idx < n_total)

    match_ref[...] = match.astype(jnp.int32)


def _cd_accuracy_nc(logits, labels):
    N, C = logits.shape
    n_tile = _choose_n_tile(N, C)
    n_blocks = pl.cdiv(N, n_tile)

    labels2 = jnp.asarray(labels).reshape(N, 1).astype(jnp.int32)
    kernel = functools.partial(_cd_accuracy_nc_kernel, n_total=N, n_tile=n_tile)

    matches = pl.pallas_call(
        kernel,
        out_shape=jax.ShapeDtypeStruct((n_blocks * n_tile, 1), jnp.int32),
        grid_spec=pltpu.PrefetchScalarGridSpec(
            num_scalar_prefetch=0,
            grid=(n_blocks,),
            in_specs=[
                pl.BlockSpec((n_tile, C), lambda i: (i, 0)),
                pl.BlockSpec((n_tile, 1), lambda i: (i, 0)),
            ],
            out_specs=pl.BlockSpec((n_tile, 1), lambda i: (i, 0)),
        ),
        compiler_params=pltpu.CompilerParams(
            dimension_semantics=("parallel",)),
    )(logits, labels2)

    total = jnp.sum(matches)
    return total.astype(jnp.float32) / jnp.float32(N)


# ----------------------------------------------------------------------------
# Top-level wrapper mirroring LabCDAccuracy.forward
# ----------------------------------------------------------------------------
def lab_cd_accuracy(output, target):
    """Returns a 0-d float32 accuracy (use float(...) for the .item() equivalent)."""
    out_cd = jnp.asarray(output["out_cd"])
    lab_cd = jnp.asarray(target["lab_cd"])

    if out_cd.ndim == 3 and out_cd.shape[1] == 1:          # squeeze(1) branch
        out_cd = out_cd.reshape(out_cd.shape[0], out_cd.shape[2])

    if out_cd.ndim == 3:                                    # (B, C, T), argmax over C
        B, _, T = out_cd.shape
        return _cd_accuracy_bct(out_cd, lab_cd.reshape(B, T))
    if out_cd.ndim == 2:                                    # (N, C), argmax over C
        return _cd_accuracy_nc(out_cd, lab_cd.reshape(-1))
    raise ValueError(f"unsupported out_cd rank: {out_cd.ndim}")


if __name__ == "__main__":
    key = jax.random.PRNGKey(0)
    k1, k2, k3, k4, k5, k6 = jax.random.split(key, 6)

    # --- 3-D (B, C, T) logits: classes on dim 1 ---
    B, C, T = 2, 32, 16
    out_cd = jax.random.normal(k1, (B, C, T), dtype=jnp.float32)
    lab_cd = jax.random.randint(k2, (B, T), 0, C, dtype=jnp.int32)
    acc = jax.block_until_ready(
        lab_cd_accuracy({"out_cd": out_cd}, {"lab_cd": lab_cd}))
    pred_ref = jnp.argmax(out_cd, axis=1).reshape(-1)
    ref = float(jnp.mean((pred_ref == lab_cd.reshape(-1)).astype(jnp.float32)))
    assert abs(float(acc) - ref) < 1e-6, (float(acc), ref)

    # --- 2-D (N, C) logits ---
    N2, C2 = 24, 40
    out_cd2 = jax.random.normal(k3, (N2, C2), dtype=jnp.float32)
    lab_cd2 = jax.random.randint(k4, (N2,), 0, C2, dtype=jnp.int32)
    acc2 = jax.block_until_ready(
        lab_cd_accuracy({"out_cd": out_cd2}, {"lab_cd": lab_cd2}))
    ref2 = float(jnp.mean(
        (jnp.argmax(out_cd2, axis=1) == lab_cd2).astype(jnp.float32)))
    assert abs(float(acc2) - ref2) < 1e-6, (float(acc2), ref2)

    # --- 3-D logits with singleton dim 1 (squeeze branch of the reference) ---
    B3, T3 = 4, 16
    out_cd3 = jax.random.normal(k5, (B3, 1, T3), dtype=jnp.float32)
    lab_cd3 = jax.random.randint(k6, (B3,), 0, T3, dtype=jnp.int32)
    acc3 = jax.block_until_ready(
        lab_cd_accuracy({"out_cd": out_cd3}, {"lab_cd": lab_cd3}))
    ref3 = float(jnp.mean(
        (jnp.argmax(out_cd3[:, 0, :], axis=1) == lab_cd3).astype(jnp.float32)))
    assert abs(float(acc3) - ref3) < 1e-6, (float(acc3), ref3)

    print("KERNEL_OK")
</pallas_src>

<mosaic_0001>
module attributes {stable_mosaic.version = 11 : i64} {
  func.func @_cd_accuracy_bct_kernel(%arg0: i32, %arg1: i32, %arg2: memref<1x32x16xf32, #tpu.memory_space<vmem>>, %arg3: memref<1x1x16xi32, #tpu.memory_space<vmem>>, %arg4: memref<1x1x16xi32, #tpu.memory_space<vmem>>) attributes {dimension_semantics = [#tpu.dimension_semantics<parallel>, #tpu.dimension_semantics<parallel>], iteration_bounds = array<i64: 2, 1>, scalar_prefetch = 0 : i64, scratch_operands = 0 : i64, tpu.core_type = #tpu.core_type<tc>, window_params = [{transform_indices = @transform_0, window_bounds = array<i64: 1, 32, 16>}, {transform_indices = @transform_1, window_bounds = array<i64: 1, 1, 16>}, {transform_indices = @transform_2, window_bounds = array<i64: 1, 1, 16>}]} {
    %c0 = arith.constant 0 : index
    %c0_0 = arith.constant 0 : index
    %c0_1 = arith.constant 0 : index
    %0 = vector.load %arg2[%c0, %c0_0, %c0_1] : memref<1x32x16xf32, #tpu.memory_space<vmem>>, vector<1x32x16xf32>
    %1 = vector.shape_cast %0 : vector<1x32x16xf32> to vector<32x16xf32>
    %c0_2 = arith.constant 0 : index
    %c0_3 = arith.constant 0 : index
    %c0_4 = arith.constant 0 : index
    %2 = vector.load %arg3[%c0_2, %c0_3, %c0_4] : memref<1x1x16xi32, #tpu.memory_space<vmem>>, vector<1x1x16xi32>
    %3 = vector.shape_cast %2 : vector<1x1x16xi32> to vector<1x16xi32>
    %cst = arith.constant dense<0xFF800000> : vector<16xf32>
    %4 = vector.multi_reduction <maximumf>, %1, %cst [0] : vector<32x16xf32> to vector<16xf32>
    %5 = vector.shape_cast %4 : vector<16xf32> to vector<1x16xf32>
    %6 = tpu.iota {dimensions = array<i32: 0>} : vector<32x16xi32>
    %7 = vector.broadcast %5 : vector<1x16xf32> to vector<32x16xf32>
    %8 = arith.cmpf oeq, %1, %7 : vector<32x16xf32>
    %c32_i32 = arith.constant 32 : i32
    %9 = vector.broadcast %c32_i32 : i32 to vector<32x16xi32>
    %10 = arith.select %8, %6, %9 : vector<32x16xi1>, vector<32x16xi32>
    %cst_5 = arith.constant dense<2147483647> : vector<16xi32>
    %11 = vector.multi_reduction <minsi>, %10, %cst_5 [0] : vector<32x16xi32> to vector<16xi32>
    %12 = vector.shape_cast %11 : vector<16xi32> to vector<1x16xi32>
    %c16_i32 = arith.constant 16 : i32
    %13 = arith.muli %arg1, %c16_i32 : i32
    %14 = tpu.iota {dimensions = array<i32: 1>} : vector<1x16xi32>
    %15 = vector.broadcast %13 : i32 to vector<1x16xi32>
    %16 = arith.addi %15, %14 : vector<1x16xi32>
    %17 = arith.cmpi eq, %12, %3 : vector<1x16xi32>
    %c16_i32_6 = arith.constant 16 : i32
    %18 = vector.broadcast %c16_i32_6 : i32 to vector<1x16xi32>
    %19 = arith.cmpi slt, %16, %18 : vector<1x16xi32>
    %20 = arith.andi %17, %19 : vector<1x16xi1>
    %21 = arith.extui %20 : vector<1x16xi1> to vector<1x16xi32>
    %c0_7 = arith.constant 0 : index
    %c0_8 = arith.constant 0 : index
    %c0_9 = arith.constant 0 : index
    %22 = vector.load %arg4[%c0_7, %c0_8, %c0_9] : memref<1x1x16xi32, #tpu.memory_space<vmem>>, vector<1x1x16xi32>
    %23 = vector.shape_cast %22 : vector<1x1x16xi32> to vector<1x16xi32>
    %24 = vector.shape_cast %21 : vector<1x16xi32> to vector<1x1x16xi32>
    tpu.vector_store %arg4[%c0_7, %c0_8, %c0_9], %24 {strides = array<i32>} : memref<1x1x16xi32, #tpu.memory_space<vmem>>, vector<1x1x16xi32>,
    return
  }
  func.func @transform_0(%arg0: i32, %arg1: i32) -> (i32, i32, i32) {
    %c0_i32 = arith.constant 0 : i32
    %c0_i32_0 = arith.constant 0 : i32
    return %arg0, %c0_i32, %arg1 : i32, i32, i32
  }
  func.func @transform_1(%arg0: i32, %arg1: i32) -> (i32, i32, i32) {
    %c0_i32 = arith.constant 0 : i32
    %c0_i32_0 = arith.constant 0 : i32
    return %arg0, %c0_i32, %arg1 : i32, i32, i32
  }
  func.func @transform_2(%arg0: i32, %arg1: i32) -> (i32, i32, i32) {
    %c1_i32 = arith.constant 1 : i32
    %0 = arith.muli %arg0, %c1_i32 : i32
    %1 = arith.addi %0, %arg1 : i32
    %c0_i32 = arith.constant 0 : i32
    %c0_i32_0 = arith.constant 0 : i32
    %c0_i32_1 = arith.constant 0 : i32
    return %1, %c0_i32, %c0_i32_0 : i32, i32, i32
  }
}

</mosaic_0001>

<bundles_post_ra>
// kernel: tpu_custom_call.1
= control target key start
LH: loop header
LB: loop body
LE: loop exit
PB: predicated region body
PF: predicated region fallthrough
CT: control target
= control target key end

     0   :  { %7 = vsyncpa [#allocation3], 0  ;;  %s624_s0 = inlined_call_operand.vmem [shape: f32[2,32,16], index: 0, kind: input, shape index: {}]   ;;  %s625_s1 = inlined_call_operand.vmem [shape: s32[2,1,16], index: 1, kind: input, shape index: {}]   ;;  %s626_s2 = inlined_call_operand.hbm [shape: s32[2,1,16], index: 2, kind: output, shape index: {}]  }
   0x1   :  { %9 = vsyncpa [#allocation3 + $0x1], 0  ;;  %s512_s9 = smov 0   ;;  %s514_s10 = smov 0  }
   0x2   :  { %s516_s11 = smov 0   ;;  %s518_s12 = smov 0  }
   0x3   :  { %s520_s13 = smov 0   ;;  %s522_s14 = smov 0  }
   0x4 LB: > { %s350_s15 = sadd.s32 4294967295, %s494_s14   ;;  %s351_s16 = sadd.s32 4294967294, %s494_s14   ;;  %s494_s14 = sphi %s522_s14, %s15_s14   ;;  %s490_s13 = sphi %s520_s13, %s633_s13   ;;  %s486_s12 = sphi %s518_s12, %s632_s12   ;;  %s482_s11 = sphi %s516_s11, %s631_s11   ;;  %s478_s10 = sphi %s514_s10, %s630_s10   ;;  %s474_s9 = sphi %s512_s9, %s629_s9  }
   0x5   : > { %s27_s17 = sadd.s32 1, %s490_s13  ;;  %s92_s18 = sadd.s32 1, %s482_s11 }
   0x6   : > { %p29_p0 = scmp.ge.s32.totalorder %s27_s17, 2  ;;  %p102_p1 = scmp.ne.s32.totalorder %s482_s11, %s478_s10 }
   0x7   : > { %p103_p2 = scmp.eq.s32.totalorder %s350_s15, 1  ;;  %p108_p3 = scmp.ne.s32.totalorder %s478_s10, %s474_s9 }
   0x8   : > { %s635_s17 = smov (%p29_p0, %s27_s17), 0  ;;  %p109_p5 = scmp.eq.s32.totalorder %s351_s16, 1 }
   0x9   : > { %p552_p4 = por %p103_p2, %p102_p1  ;;  %s89_s20 = ssub.s32 %s490_s13, %s635_s17 }
   0xa   : > { %p354_p6 = scmp.ge.s32.totalorder %s494_s14, 1  ;;  %p90_p7 = scmp.eq.s32.totalorder %s89_s20, 0 }
   0xb   : > { %p559_p8 = por %p109_p5, %p108_p3  ;;  %p147_p9 = scmp.lt.s32.totalorder %s494_s14, 3 }
   0xc   : > { %s565_s22 = scalar_select %p90_p7, %s482_s11, %s92_s18  }
   0xd   : > { %p148_p10 = pnand %p354_p6, %p147_p9 }
   0xe   : > { %p177_p11 = scmp.lt.s32.totalorder (!%p148_p10), %s486_s12, 1  ;;  %s175_s28 = sand.u32 (!%p148_p10), 1, %s478_s10  }
   0xf   : > { %151 = sbr.rel (%p148_p10) target bundleno = 69 (0x45), region = 28  ;;  %s264_s6 = scalar_lea.hbm (!%p148_p10), %s626_s2, %s486_s12 }
  0x10   : > { %s176_s7 = scalar_lea.vmem (!%p148_p10), [#allocation2], %s175_s28  ;;  %s268_s15 = sshll.u32 (!%p148_p10), %s264_s6, 4  ;;  %s269_s15 = int_to_ptr.hbm [resolvable:$true] %s268_s15 }
  0x11   : > { %s266_s8 = sshll.u32 (!%p148_p10), %s176_s7, 4  ;;  %s255_s16 = scalar_lea.sflag (!%p148_p10), [#allocation3], %s175_s28  ;;  %s267_s8 = int_to_ptr.vmem [resolvable:$true] %s266_s8 }
  0x12   : > { %s430_s18 = sshra.s32 (!%p148_p10), %s269_s15, 4  ;;  %s431_s18 = int_to_ptr.hbm [resolvable:$true] %s430_s18 }
  0x13   : > { %p437_p1 = scmp.lt.s32.totalorder (!%p148_p10), %s431_s18, %s626_s2 }
  0x14   : > { %s569_s23 = scalar_select %p177_p11, %s486_s12, 1  ;;  %vm197_vm0 = vcmask 130048   ;;  %v211_v12 = vlaneseq  ;;  %vm252_vm13 = vcmask 122880   ;;  %v496_v41 = vmov 0  }
  0x15   : > { %s432_s12 = scalar_lea.hbm %s431_s18, 1 }
  0x16   : > { %s359_s24 = sshll.u32 %s569_s23, 5  ;;  %v212_v15 = vshrl.u32 %v211_v12, 7  ;;  %s190_s3 = scalar_lea.vmem %s625_s1, %s569_s23  ;;  %v245_v36 = vand.u32 127, %v211_v12 }
  0x17   : > { %s184_s27 = scalar_lea.vmem %s624_s0, %s359_s24  ;;  %v196_v39 = vld [vmem:[%s190_s3] sm:$0x1]  ;;  %p433_p12 = scmp.ne.s32.totalorder %s431_s18, %s432_s12 }
  0x18   : > { %v192_v0 = vld [vmem:[%s184_s27] sm:$0xff]  ;;  %v193_v1 = vld [vmem:[%s184_s27 + $0x8] sm:$0xff]  ;;  %v194_v2 = vld [vmem:[%s184_s27 + $0x10] sm:$0xff]  ;;  %v213_v18 = vadd.s32 8, %v212_v15  ;;  %v214_v19 = vadd.s32 16, %v212_v15  ;;  %v215_v20 = vadd.s32 24, %v212_v15 }
  0x19   : > { %v195_v3 = vld [vmem:[%s184_s27 + $0x18] sm:$0xff]  ;;  %v198_v4 = vsel %vm197_vm0, %v192_v0, -inf  ;;  %v199_v5 = vsel %vm197_vm0, %v193_v1, -inf  ;;  %v200_v6 = vsel %vm197_vm0, %v194_v2, -inf  ;;  %vm249_vm11 = vcmp.lt.s32.totalorder %v245_v36, 16  ;;  %p434_p13 = pnand %p433_p12, %p552_p4  ;;  %s436_s24 = scalar_lea.hbm %s626_s2, 2 }
  0x1a   : > { %v201_v7 = vsel %vm197_vm0, %v195_v3, -inf  ;;  %v202_v8 = vmax.f32 %v198_v4, %v199_v5  ;;  %p438_p2 = scmp.lt.s32.totalorder %s436_s24, %s432_s12 }
  0x1b   : > { %v203_v9 = vmax.f32 %v200_v6, %v201_v7  ;;  %p435_p0 = pneg %p434_p13 }
  0x1c   : > { %p439_p3 = por %p438_p2, %p437_p1 }
  0x1d   : > { %v204_v10 = vmax.f32 %v202_v8, %v203_v9 }
  0x1e   : > { %p440_p5 = pnand %p439_p3, %p435_p0 }
  0x1f   : > { %v205_v11 = vrot.slane %v204_v10, 4 }
  0x21   : > { %v206_v13 = vmax.f32 %v204_v10, %v205_v11 }
  0x23   : > { %v207_v14 = vrot.slane %v206_v13, 2 }
  0x25   : > { %v208_v16 = vmax.f32 %v206_v13, %v207_v14 }
  0x27   : > { %v209_v17 = vrot.slane %v208_v16, 1 }
  0x29   : > { %v210_v21 = vmax.f32 %v208_v16, %v209_v17 }
  0x2b   : > { %vm216_vm1 = vcmp.eq.f32.partialorder %v192_v0, %v210_v21  ;;  %vm217_vm2 = vcmp.eq.f32.partialorder %v193_v1, %v210_v21  ;;  %vm218_vm3 = vcmp.eq.f32.partialorder %v194_v2, %v210_v21  ;;  %vm219_vm4 = vcmp.eq.f32.partialorder %v195_v3, %v210_v21 }
  0x2c   : > { %v220_v22 = vsel %vm216_vm1, %v212_v15, 32  ;;  %v221_v23 = vsel %vm217_vm2, %v213_v18, 32  ;;  %v222_v24 = vsel %vm218_vm3, %v214_v19, 32  ;;  %v223_v25 = vsel %vm219_vm4, %v215_v20, 32 }
  0x2d   : > { %v224_v26 = vsel %vm197_vm0, %v220_v22, 2147483647  ;;  %v225_v27 = vsel %vm197_vm0, %v221_v23, 2147483647  ;;  %v226_v28 = vsel %vm197_vm0, %v222_v24, 2147483647 }
  0x2e   : > { %v227_v29 = vsel %vm197_vm0, %v223_v25, 2147483647  ;;  %vm228_vm5 = vcmp.lt.s32.totalorder %v224_v26, %v225_v27 }
  0x2f   : > { %v229_v30 = vsel %vm228_vm5, %v224_v26, %v225_v27  ;;  %vm230_vm6 = vcmp.lt.s32.totalorder %v226_v28, %v227_v29 }
  0x30   : > { %v231_v31 = vsel %vm230_vm6, %v226_v28, %v227_v29 }
  0x31   : > { %vm232_vm7 = vcmp.lt.s32.totalorder %v229_v30, %v231_v31 }
  0x32   : > { %v233_v32 = vsel %vm232_vm7, %v229_v30, %v231_v31 }
  0x33   : > { %v234_v33 = vrot.slane %v233_v32, 4 }
  0x35   : > { %vm235_vm8 = vcmp.lt.s32.totalorder %v233_v32, %v234_v33 }
  0x36   : > { %v236_v34 = vsel %vm235_vm8, %v233_v32, %v234_v33 }
  0x37   : > { %v237_v35 = vrot.slane %v236_v34, 2 }
  0x39   : > { %vm238_vm9 = vcmp.lt.s32.totalorder %v236_v34, %v237_v35 }
  0x3a   : > { %v239_v37 = vsel %vm238_vm9, %v236_v34, %v237_v35 }
  0x3b   : > { %v240_v38 = vrot.slane %v239_v37, 1 }
  0x3d   : > { %vm241_vm10 = vcmp.lt.s32.totalorder %v239_v37, %v240_v38 }
  0x3e   : > { %v242_v40 = vsel %vm241_vm10, %v239_v37, %v240_v38 }
  0x3f   : > { %vm248_vm12 = vcmp.eq.s32.totalorder %v242_v40, %v196_v39 }
  0x40   : > { %vm250_vm14 = vmand %vm248_vm12, %vm249_vm11 }
  0x41   : > { %v251_v42 = vsel %vm250_vm14, 1, %v496_v41 }
  0x42   : > { %253 = vst.msk [vmem:[%s176_s7] sm:$0x1] %vm252_vm13, %v251_v42 }
  0x43   : > { %443 = shalt.err (!%p440_p5)
}
  0x44   : > { %360 = dma.vmem_to_hbm [thread:$0]  (%p552_p4), %s267_s8, 16, %s269_s15, %s255_s16  }
  0x45 PF: > { %p366_p6 = scmp.ge.s32.totalorder %s494_s14, 2  ;;  %s280_s27 = sand.u32 1, %s474_s9  }
  0x46   : > { %s281_s28 = scalar_lea.sflag [#allocation3], %s280_s27 }
  0x47   : > { %p363_p7 = pnand %p366_p6, %p559_p8 }
  0x49   : > { %p364_p9 = pneg %p363_p7 }
  0x4b   : > { %469 = dma.done.wait (%p364_p9), %s281_s28, 16  }
  0x4c   : > { %471 = vsyncadd (%p364_p9), %s281_s28, 4294967280  ;;  %s15_s14 = sadd.s32 1, %s494_s14   ;;  %s629_s9 = smov %s478_s10 }
  0x4d   : > { %p12_p10 = scmp.ge.s32.totalorder %s15_s14, 4   ;;  %s630_s10 = smov %s482_s11 }
  0x4e   : > { %s631_s11 = smov %s565_s22  ;;  %s632_s12 = smov %s490_s13 }
  0x4f   : > { %s633_s13 = smov %s635_s17  ;;  %14 = sbr.rel (!%p12_p10) target bundleno = 4 (0x4), region = 66 }
  0x54   :  { %286 = vsyncpa [#allocation3], 1 }
  0x55   :  { %288 = vsyncpa [#allocation3 + $0x1], 1 }

</bundles_post_ra>
